<compile_context>
chip_gen: v5e
topology: v5e:2x2
jax: 0.10.0
libtpu: 0.0.40
codegen_flags: <defaults>
</compile_context>

<pallas_src>
import functools

import jax
import jax.numpy as jnp
from jax.experimental import pallas as pl
from jax.experimental.pallas import tpu as pltpu


_VMEM_LIMIT_BYTES = 40 * 1024 * 1024  # safe on v5e (128 MiB), v6e (128), v7x (64)


def _round_up(x: int, m: int) -> int:
    return ((x + m - 1) // m) * m


def _pick_nnz_tile(nnz: int, d_pad: int, f_pad: int) -> int:
    # ~4 MiB budget for the largest (TN x max(D,F)) f32 tile; keeps the full
    # pipeline (double-buffered IO + resident pooled block) well under the
    # default scoped-VMEM limit on all three generations.
    budget = 4 * 1024 * 1024
    tn = budget // (4 * max(d_pad, f_pad))
    tn = (tn // 128) * 128
    tn = max(128, min(1024, tn))
    tn = min(tn, _round_up(max(nnz, 1), 128))
    return int(tn)


# ---------------------------------------------------------------------------
# Phase 1: pooled[d, f] = sum_k [idx[k] == d] * vals[k, f]   (segment sum)
# ---------------------------------------------------------------------------
def _seg_sum_kernel(idx_ref, val_ref, pooled_ref):
    k = pl.program_id(0)

    @pl.when(k == 0)
    def _init():
        pooled_ref[...] = jnp.zeros_like(pooled_ref)

    idx = idx_ref[...]                    # (1, TN) int32
    vals = val_ref[...]                   # (TN, F_pad), input dtype (no up-cast)
    d_pad = pooled_ref.shape[0]
    tn = vals.shape[0]

    # Transposed one-hot built directly so the matmul runs in natural MXU
    # orientation (no transposed (TN, D) operand).
    rows = jax.lax.broadcasted_iota(jnp.int32, (d_pad, tn), 0)
    oh_t = (idx == rows).astype(vals.dtype)          # (D_pad, TN), exact 0/1

    pooled_ref[...] += jnp.dot(oh_t, vals, preferred_element_type=jnp.float32)


# ---------------------------------------------------------------------------
# Phase 2: out[k, f] = pooled[idx[k], f]   (gather back to nonzeros)
# ---------------------------------------------------------------------------
def _gather_kernel(idx_ref, pooled_ref, out_ref):
    idx = idx_ref[...]                    # (TN, 1) int32
    tn = out_ref.shape[0]
    d_pad = pooled_ref.shape[0]

    lanes = jax.lax.broadcasted_iota(jnp.int32, (tn, d_pad), 1)
    oh = (idx == lanes).astype(out_ref.dtype)        # (TN, D_pad), exact 0/1
    pooled = pooled_ref[...].astype(out_ref.dtype)   # exact row selection below

    out_ref[...] = jnp.dot(
        oh, pooled, preferred_element_type=jnp.float32
    ).astype(out_ref.dtype)


# ---------------------------------------------------------------------------
# Wrapper
# ---------------------------------------------------------------------------
@functools.partial(jax.jit, static_argnames=("size", "axis"))
def pool(indices: jax.Array, values: jax.Array, size, axis: int = 0) -> jax.Array:
    """Pallas implementation of Pool.forward for a coalesced COO sparse matrix.

    indices: (2, nnz) int   values: (nnz,) or (nnz, F)   size: (R, C)
    Returns (nnz,) or (nnz, F) matching the PyTorch module's output.
    """
    idx = indices[1 - axis].astype(jnp.int32)                  # (nnz,)
    nnz = idx.shape[0]
    pooled_dim = int(size[1 - axis])

    squeeze = values.ndim == 1
    vals = values[:, None] if squeeze else values              # (nnz, F)
    feat = vals.shape[1]
    vdt = vals.dtype

    d_pad = _round_up(pooled_dim, 128)
    f_pad = _round_up(feat, 128)
    tn = _pick_nnz_tile(nnz, d_pad, f_pad)
    nnz_pad = _round_up(max(nnz, 1), tn)
    num_tiles = nnz_pad // tn

    # Pad: extra nnz rows get idx=0 / value=0 -> no effect on segment sums,
    # and their gathered rows are sliced off below.  Extra D columns are never
    # hit (idx < pooled_dim); extra F columns are zero and sliced off.
    idx_pad = jnp.zeros((nnz_pad,), jnp.int32).at[:nnz].set(idx)
    vals_pad = jnp.zeros((nnz_pad, f_pad), vdt).at[:nnz, :feat].set(vals)

    # ---- Phase 1: tiled segment-sum reduction into a resident pooled block.
    pooled = pl.pallas_call(
        _seg_sum_kernel,
        out_shape=jax.ShapeDtypeStruct((d_pad, f_pad), jnp.float32),
        grid_spec=pltpu.PrefetchScalarGridSpec(
            num_scalar_prefetch=0,
            grid=(num_tiles,),
            in_specs=[
                pl.BlockSpec((1, tn), lambda i: (0, i)),          # idx (row layout)
                pl.BlockSpec((tn, f_pad), lambda i: (i, 0)),      # values tile
            ],
            out_specs=pl.BlockSpec((d_pad, f_pad), lambda i: (0, 0)),  # resident acc
        ),
        compiler_params=pltpu.CompilerParams(
            dimension_semantics=("arbitrary",),
            vmem_limit_bytes=_VMEM_LIMIT_BYTES,
        ),
    )(idx_pad[None, :], vals_pad)

    # ---- Phase 2: tiled gather of pooled rows back to every nonzero.
    out_pad = pl.pallas_call(
        _gather_kernel,
        out_shape=jax.ShapeDtypeStruct((nnz_pad, f_pad), vdt),
        grid_spec=pltpu.PrefetchScalarGridSpec(
            num_scalar_prefetch=0,
            grid=(num_tiles,),
            in_specs=[
                pl.BlockSpec((tn, 1), lambda i: (i, 0)),          # idx (col layout)
                pl.BlockSpec((d_pad, f_pad), lambda i: (0, 0)),   # pooled, resident
            ],
            out_specs=pl.BlockSpec((tn, f_pad), lambda i: (i, 0)),
        ),
        compiler_params=pltpu.CompilerParams(
            dimension_semantics=("parallel",),                    # shards across v7x TCs
            vmem_limit_bytes=_VMEM_LIMIT_BYTES,
        ),
    )(idx_pad[:, None], pooled)

    out = out_pad[:nnz, :feat]
    return out[:, 0] if squeeze else out


def _reference(indices, values, size, axis=0):
    """Pure-JAX reference matching the PyTorch forward."""
    idx = indices[1 - axis].astype(jnp.int32)
    pooled = jax.ops.segment_sum(values, idx, num_segments=int(size[1 - axis]))
    return pooled[idx]


if __name__ == "__main__":
    key = jax.random.PRNGKey(0)
    R, C, NNZ, F = 16, 16, 64, 32

    k_idx, k_val, k_val1 = jax.random.split(key, 3)
    # unique (row, col) pairs -> already-coalesced sparse tensor
    flat = jax.random.permutation(k_idx, R * C)[:NNZ]
    rows = (flat // C).astype(jnp.int32)
    cols = (flat % C).astype(jnp.int32)
    indices = jnp.stack([rows, cols])                             # (2, nnz)
    values_2d = jax.random.normal(k_val, (NNZ, F), dtype=jnp.float32)
    values_1d = jax.random.normal(k_val1, (NNZ,), dtype=jnp.float32)

    ok = True
    for axis in (0, 1):
        for vals in (values_2d, values_1d):
            out = pool(indices, vals, (R, C), axis=axis)
            jax.block_until_ready(out)
            ref = _reference(indices, vals, (R, C), axis=axis)
            ok &= bool(jnp.allclose(out, ref, atol=1e-5, rtol=1e-5))
            assert out.shape == vals.shape

    if ok:
        print("KERNEL_OK")
    else:
        print("KERNEL_MISMATCH")
</pallas_src>

<mosaic_0001>
module attributes {stable_mosaic.version = 11 : i64} {
  func.func @_seg_sum_kernel(%arg0: i32, %arg1: memref<1x128xi32, #tpu.memory_space<vmem>>, %arg2: memref<128x128xf32, #tpu.memory_space<vmem>>, %arg3: memref<128x128xf32, #tpu.memory_space<vmem>>) attributes {dimension_semantics = [#tpu.dimension_semantics<arbitrary>], iteration_bounds = array<i64: 1>, scalar_prefetch = 0 : i64, scratch_operands = 0 : i64, tpu.core_type = #tpu.core_type<tc>, window_params = [{transform_indices = @transform_0, window_bounds = array<i64: 1, 128>}, {transform_indices = @transform_1, window_bounds = array<i64: 128, 128>}, {pipeline_mode = #tpu.pipeline_mode<synchronous>, transform_indices = @transform_2, window_bounds = array<i64: 128, 128>}]} {
    %c0_i32 = arith.constant 0 : i32
    %0 = arith.cmpi eq, %arg0, %c0_i32 : i32
    %1 = arith.extui %0 : i1 to i32
    %c0_i32_0 = arith.constant 0 : i32
    %2 = arith.cmpi ne, %1, %c0_i32_0 : i32
    scf.if %2 {
      %cst_8 = arith.constant 0.000000e+00 : f32
      %14 = vector.broadcast %cst_8 : f32 to vector<128x128xf32>
      %c0_9 = arith.constant 0 : index
      %c0_10 = arith.constant 0 : index
      %15 = vector.load %arg3[%c0_9, %c0_10] : memref<128x128xf32, #tpu.memory_space<vmem>>, vector<128x128xf32>
      tpu.vector_store %arg3[%c0_9, %c0_10], %14 {strides = array<i32>} : memref<128x128xf32, #tpu.memory_space<vmem>>, vector<128x128xf32>,
    } else {
    }
    %c0 = arith.constant 0 : index
    %c0_1 = arith.constant 0 : index
    %3 = vector.load %arg1[%c0, %c0_1] : memref<1x128xi32, #tpu.memory_space<vmem>>, vector<1x128xi32>
    %c0_2 = arith.constant 0 : index
    %c0_3 = arith.constant 0 : index
    %4 = vector.load %arg2[%c0_2, %c0_3] : memref<128x128xf32, #tpu.memory_space<vmem>>, vector<128x128xf32>
    %5 = tpu.iota {dimensions = array<i32: 0>} : vector<128x128xi32>
    %6 = vector.broadcast %3 : vector<1x128xi32> to vector<128x128xi32>
    %7 = arith.cmpi eq, %6, %5 : vector<128x128xi32>
    %8 = arith.extui %7 : vector<128x128xi1> to vector<128x128xi32>
    %9 = arith.sitofp %8 : vector<128x128xi32> to vector<128x128xf32>
    %c0_4 = arith.constant 0 : index
    %c0_5 = arith.constant 0 : index
    %10 = vector.load %arg3[%c0_4, %c0_5] : memref<128x128xf32, #tpu.memory_space<vmem>>, vector<128x128xf32>
    %cst = arith.constant dense<0.000000e+00> : vector<128x128xf32>
    %11 = tpu.matmul %9, %4, %cst {dimension_numbers = #tpu.dot_dimension_numbers<[1], [0], [0], [1], [0, 0, 1, 1], [], []>} : vector<128x128xf32>, vector<128x128xf32>, vector<128x128xf32> -> vector<128x128xf32>
    %12 = arith.addf %10, %11 : vector<128x128xf32>
    %c0_6 = arith.constant 0 : index
    %c0_7 = arith.constant 0 : index
    %13 = vector.load %arg3[%c0_6, %c0_7] : memref<128x128xf32, #tpu.memory_space<vmem>>, vector<128x128xf32>
    tpu.vector_store %arg3[%c0_6, %c0_7], %12 {strides = array<i32>} : memref<128x128xf32, #tpu.memory_space<vmem>>, vector<128x128xf32>,
    return
  }
  func.func @transform_0(%arg0: i32) -> (i32, i32) {
    %c0_i32 = arith.constant 0 : i32
    %c0_i32_0 = arith.constant 0 : i32
    return %c0_i32, %arg0 : i32, i32
  }
  func.func @transform_1(%arg0: i32) -> (i32, i32) {
    %c0_i32 = arith.constant 0 : i32
    %c0_i32_0 = arith.constant 0 : i32
    return %arg0, %c0_i32 : i32, i32
  }
  func.func @transform_2(%arg0: i32) -> (i32, i32) {
    %c0_i32 = arith.constant 0 : i32
    %c0_i32_0 = arith.constant 0 : i32
    %c0_i32_1 = arith.constant 0 : i32
    return %c0_i32, %c0_i32_0 : i32, i32
  }
}

module attributes {stable_mosaic.version = 11 : i64} {
  func.func @_gather_kernel(%arg0: i32, %arg1: memref<128x1xi32, #tpu.memory_space<vmem>>, %arg2: memref<128x128xf32, #tpu.memory_space<vmem>>, %arg3: memref<128x128xf32, #tpu.memory_space<vmem>>) attributes {dimension_semantics = [#tpu.dimension_semantics<parallel>], iteration_bounds = array<i64: 1>, scalar_prefetch = 0 : i64, scratch_operands = 0 : i64, tpu.core_type = #tpu.core_type<tc>, window_params = [{transform_indices = @transform_0, window_bounds = array<i64: 128, 1>}, {pipeline_mode = #tpu.pipeline_mode<synchronous>, transform_indices = @transform_1, window_bounds = array<i64: 128, 128>}, {transform_indices = @transform_2, window_bounds = array<i64: 128, 128>}]} {
    %c0 = arith.constant 0 : index
    %c0_0 = arith.constant 0 : index
    %0 = vector.load %arg1[%c0, %c0_0] : memref<128x1xi32, #tpu.memory_space<vmem>>, vector<128x1xi32>
    %1 = tpu.iota {dimensions = array<i32: 1>} : vector<128x128xi32>
    %2 = vector.broadcast %0 : vector<128x1xi32> to vector<128x128xi32>
    %3 = arith.cmpi eq, %2, %1 : vector<128x128xi32>
    %4 = arith.extui %3 : vector<128x128xi1> to vector<128x128xi32>
    %5 = arith.sitofp %4 : vector<128x128xi32> to vector<128x128xf32>
    %c0_1 = arith.constant 0 : index
    %c0_2 = arith.constant 0 : index
    %6 = vector.load %arg2[%c0_1, %c0_2] : memref<128x128xf32, #tpu.memory_space<vmem>>, vector<128x128xf32>
    %cst = arith.constant dense<0.000000e+00> : vector<128x128xf32>
    %7 = tpu.matmul %5, %6, %cst {dimension_numbers = #tpu.dot_dimension_numbers<[1], [0], [0], [1], [0, 0, 1, 1], [], []>} : vector<128x128xf32>, vector<128x128xf32>, vector<128x128xf32> -> vector<128x128xf32>
    %c0_3 = arith.constant 0 : index
    %c0_4 = arith.constant 0 : index
    %8 = vector.load %arg3[%c0_3, %c0_4] : memref<128x128xf32, #tpu.memory_space<vmem>>, vector<128x128xf32>
    tpu.vector_store %arg3[%c0_3, %c0_4], %7 {strides = array<i32>} : memref<128x128xf32, #tpu.memory_space<vmem>>, vector<128x128xf32>,
    return
  }
  func.func @transform_0(%arg0: i32) -> (i32, i32) {
    %c0_i32 = arith.constant 0 : i32
    %c0_i32_0 = arith.constant 0 : i32
    return %arg0, %c0_i32 : i32, i32
  }
  func.func @transform_1(%arg0: i32) -> (i32, i32) {
    %c0_i32 = arith.constant 0 : i32
    %c0_i32_0 = arith.constant 0 : i32
    %c0_i32_1 = arith.constant 0 : i32
    return %c0_i32, %c0_i32_0 : i32, i32
  }
  func.func @transform_2(%arg0: i32) -> (i32, i32) {
    %c0_i32 = arith.constant 0 : i32
    %c0_i32_0 = arith.constant 0 : i32
    return %arg0, %c0_i32 : i32, i32
  }
}

</mosaic_0001>

<bundles_post_ra>
// kernel: pool.2
= control target key start
LH: loop header
LB: loop body
LE: loop exit
PB: predicated region body
PF: predicated region fallthrough
CT: control target
= control target key end

     0   :  { %v48_v10 = vlaneseq  ;;  %v314_v22 = vmov 1.0   ;;  %s465_s1 = inlined_call_operand.vmem [shape: f32[128,128], index: 1, kind: input, shape index: {}]   ;;  %s466_s0 = inlined_call_operand.vmem [shape: s32[1,128], index: 0, kind: input, shape index: {}]   ;;  %s467_s2 = inlined_call_operand.vmem [shape: f32[128,128], index: 2, kind: output, shape index: {}]  }
   0x1   :  { %v47_v0 = vld [vmem:[%s465_s1 + $0x78] sm:$0xff]  ;;  %v46_v1 = vld [vmem:[%s465_s1 + $0x70] sm:$0xff]  ;;  %v45_v2 = vld [vmem:[%s465_s1 + $0x68] sm:$0xff] }
   0x2   :  { %264 = vmatpush.msra.mxu2 %v47_v0  ;;  %265 = vmatpush.msra.mxu3 %v47_v0  ;;  %v44_v3 = vld [vmem:[%s465_s1 + $0x60] sm:$0xff]  ;;  %v43_v4 = vld [vmem:[%s465_s1 + $0x58] sm:$0xff]  ;;  %v42_v5 = vld [vmem:[%s465_s1 + $0x50] sm:$0xff]  ;;  %v366_v13 = vshrl.u32 %v48_v10, 7 }
   0x3   :  { %130 = vmatpush.msra.mxu0 %v47_v0  ;;  %263 = vmatpush.msra.mxu1 %v47_v0  ;;  %v41_v6 = vld [vmem:[%s465_s1 + $0x48] sm:$0xff]  ;;  %v40_v7 = vld [vmem:[%s465_s1 + $0x40] sm:$0xff]  ;;  %v39_v8 = vld [vmem:[%s465_s1 + $0x38] sm:$0xff] }
   0x4   :  { %267 = vmatpush.msra.mxu2 %v46_v1  ;;  %268 = vmatpush.msra.mxu3 %v46_v1  ;;  %v38_v9 = vld [vmem:[%s465_s1 + $0x30] sm:$0xff]  ;;  %v37_v11 = vld [vmem:[%s465_s1 + $0x28] sm:$0xff]  ;;  %v36_v12 = vld [vmem:[%s465_s1 + $0x20] sm:$0xff]  ;;  %v57_v16 = vadd.s32 64, %v366_v13  ;;  %v61_v18 = vadd.s32 96, %v366_v13  ;;  %v53_v20 = vadd.s32 32, %v366_v13 }
   0x5   :  { %131 = vmatpush.msra.mxu0 %v46_v1  ;;  %266 = vmatpush.msra.mxu1 %v46_v1  ;;  %v35_v14 = vld [vmem:[%s465_s1 + $0x18] sm:$0xff]  ;;  %v34_v15 = vld [vmem:[%s465_s1 + $0x10] sm:$0xff]  ;;  %v378_v17 = vld [vmem:[%s466_s0] ss:$0 sm:$0xff]  ;;  %v58_v23 = vadd.s32 72, %v366_v13  ;;  %v62_v24 = vadd.s32 104, %v366_v13 }
   0x6   :  { %270 = vmatpush.msra.mxu2 %v45_v2  ;;  %271 = vmatpush.msra.mxu3 %v45_v2  ;;  %v33_v19 = vld [vmem:[%s465_s1 + $0x8] sm:$0xff]  ;;  %v32_v21 = vld [vmem:[%s465_s1] sm:$0xff]  ;;  %vm74_vm0 = vcmp.eq.s32.totalorder %v378_v17, %v57_v16  ;;  %vm78_vm1 = vcmp.eq.s32.totalorder %v378_v17, %v61_v18  ;;  %vm66_vm2 = vcmp.eq.s32.totalorder %v378_v17, %v366_v13  ;;  %v50_v25 = vadd.s32 8, %v366_v13 }
   0x7   :  { %132 = vmatpush.msra.mxu0 %v45_v2  ;;  %269 = vmatpush.msra.mxu1 %v45_v2  ;;  %vm70_vm3 = vcmp.eq.s32.totalorder %v378_v17, %v53_v20  ;;  %v54_v26 = vadd.s32 40, %v366_v13  ;;  %vm75_vm4 = vcmp.eq.s32.totalorder %v378_v17, %v58_v23  ;;  %vm79_vm5 = vcmp.eq.s32.totalorder %v378_v17, %v62_v24 }
   0x8   :  { %273 = vmatpush.msra.mxu2 %v44_v3  ;;  %274 = vmatpush.msra.mxu3 %v44_v3  ;;  %vm67_vm6 = vcmp.eq.s32.totalorder %v378_v17, %v50_v25  ;;  %v59_v27 = vadd.s32 80, %v366_v13  ;;  %v63_v28 = vadd.s32 112, %v366_v13  ;;  %v51_v29 = vadd.s32 16, %v366_v13 }
   0x9   :  { %133 = vmatpush.msra.mxu0 %v44_v3  ;;  %272 = vmatpush.msra.mxu1 %v44_v3  ;;  %vm71_vm7 = vcmp.eq.s32.totalorder %v378_v17, %v54_v26  ;;  %v55_v30 = vadd.s32 48, %v366_v13  ;;  %v60_v31 = vadd.s32 88, %v366_v13  ;;  %v64_v32 = vadd.s32 120, %v366_v13 }
   0xa   :  { %276 = vmatpush.msra.mxu2 %v43_v4  ;;  %277 = vmatpush.msra.mxu3 %v43_v4  ;;  %vm76_vm8 = vcmp.eq.s32.totalorder %v378_v17, %v59_v27  ;;  %vm80_vm9 = vcmp.eq.s32.totalorder %v378_v17, %v63_v28  ;;  %vm68_vm10 = vcmp.eq.s32.totalorder %v378_v17, %v51_v29  ;;  %v52_v33 = vadd.s32 24, %v366_v13 }
   0xb   :  { %134 = vmatpush.msra.mxu0 %v43_v4  ;;  %275 = vmatpush.msra.mxu1 %v43_v4  ;;  %vm72_vm11 = vcmp.eq.s32.totalorder %v378_v17, %v55_v30  ;;  %v56_v34 = vadd.s32 56, %v366_v13  ;;  %vm77_vm12 = vcmp.eq.s32.totalorder %v378_v17, %v60_v31  ;;  %vm81_vm13 = vcmp.eq.s32.totalorder %v378_v17, %v64_v32 }
   0xc   :  { %279 = vmatpush.msra.mxu2 %v42_v5  ;;  %280 = vmatpush.msra.mxu3 %v42_v5  ;;  %vm69_vm14 = vcmp.eq.s32.totalorder %v378_v17, %v52_v33 }
   0xd   :  { %135 = vmatpush.msra.mxu0 %v42_v5  ;;  %278 = vmatpush.msra.mxu1 %v42_v5  ;;  %vm73_vm15 = vcmp.eq.s32.totalorder %v378_v17, %v56_v34 }
   0xe   :  { %282 = vmatpush.msra.mxu2 %v41_v6  ;;  %283 = vmatpush.msra.mxu3 %v41_v6 }
   0xf   :  { %136 = vmatpush.msra.mxu0 %v41_v6  ;;  %281 = vmatpush.msra.mxu1 %v41_v6 }
  0x10   :  { %285 = vmatpush.msra.mxu2 %v40_v7  ;;  %286 = vmatpush.msra.mxu3 %v40_v7 }
  0x11   :  { %137 = vmatpush.msra.mxu0 %v40_v7  ;;  %284 = vmatpush.msra.mxu1 %v40_v7 }
  0x12   :  { %288 = vmatpush.msra.mxu2 %v39_v8  ;;  %289 = vmatpush.msra.mxu3 %v39_v8 }
  0x13   :  { %138 = vmatpush.msra.mxu0 %v39_v8  ;;  %287 = vmatpush.msra.mxu1 %v39_v8 }
  0x14   :  { %291 = vmatpush.msra.mxu2 %v38_v9  ;;  %292 = vmatpush.msra.mxu3 %v38_v9 }
  0x15   :  { %139 = vmatpush.msra.mxu0 %v38_v9  ;;  %290 = vmatpush.msra.mxu1 %v38_v9 }
  0x16   :  { %294 = vmatpush.msra.mxu2 %v37_v11  ;;  %295 = vmatpush.msra.mxu3 %v37_v11 }
  0x17   :  { %140 = vmatpush.msra.mxu0 %v37_v11  ;;  %293 = vmatpush.msra.mxu1 %v37_v11 }
  0x18   :  { %297 = vmatpush.msra.mxu2 %v36_v12  ;;  %298 = vmatpush.msra.mxu3 %v36_v12 }
  0x19   :  { %141 = vmatpush.msra.mxu0 %v36_v12  ;;  %296 = vmatpush.msra.mxu1 %v36_v12 }
  0x1a   :  { %300 = vmatpush.msra.mxu2 %v35_v14  ;;  %301 = vmatpush.msra.mxu3 %v35_v14 }
  0x1b   :  { %142 = vmatpush.msra.mxu0 %v35_v14  ;;  %299 = vmatpush.msra.mxu1 %v35_v14 }
  0x1c   :  { %303 = vmatpush.msra.mxu2 %v34_v15  ;;  %304 = vmatpush.msra.mxu3 %v34_v15 }
  0x1d   :  { %143 = vmatpush.msra.mxu0 %v34_v15  ;;  %302 = vmatpush.msra.mxu1 %v34_v15 }
  0x1e   :  { %306 = vmatpush.msra.mxu2 %v33_v19  ;;  %307 = vmatpush.msra.mxu3 %v33_v19 }
  0x1f   :  { %144 = vmatpush.msra.mxu0 %v33_v19  ;;  %305 = vmatpush.msra.mxu1 %v33_v19 }
  0x20   :  { %309 = vmatpush.msra.mxu2 %v32_v21  ;;  %310 = vmatpush.msra.mxu3 %v32_v21 }
  0x21   :  { %255 = vmatmul.msk.f32.vlgmr.msra.gmra.mxu2 %vm74_vm0, %v314_v22  ;;  %259 = vmatmul.msk.f32.vlgmr.msra.gmra.mxu3 %vm78_vm1, %v314_v22 }
  0x22   :  { %145 = vmatpush.msra.mxu0 %v32_v21  ;;  %308 = vmatpush.msra.mxu1 %v32_v21 }
  0x23   :  { %247 = vmatmul.msk.f32.vlgmr.msra.gmra.mxu0 %vm66_vm2, %v314_v22  ;;  %251 = vmatmul.msk.f32.vlgmr.msra.gmra.mxu1 %vm70_vm3, %v314_v22 }
  0x29   :  { %256 = vmatmul.msk.f32.gmra.mxu2 %vm75_vm4, %v314_v22  ;;  %260 = vmatmul.msk.f32.gmra.mxu3 %vm79_vm5, %v314_v22 }
  0x2b   :  { %248 = vmatmul.msk.f32.gmra.mxu0 %vm67_vm6, %v314_v22  ;;  %252 = vmatmul.msk.f32.gmra.mxu1 %vm71_vm7, %v314_v22 }
  0x31   :  { %257 = vmatmul.msk.f32.gmra.mxu2 %vm76_vm8, %v314_v22  ;;  %261 = vmatmul.msk.f32.gmra.mxu3 %vm80_vm9, %v314_v22 }
  0x33   :  { %249 = vmatmul.msk.f32.gmra.mxu0 %vm68_vm10, %v314_v22  ;;  %253 = vmatmul.msk.f32.gmra.mxu1 %vm72_vm11, %v314_v22 }
  0x39   :  { %258 = vmatmul.msk.f32.gmra.mxu2 %vm77_vm12, %v314_v22  ;;  %262 = vmatmul.msk.f32.gmra.mxu3 %vm81_vm13, %v314_v22 }
  0x3b   :  { %250 = vmatmul.msk.f32.gmra.mxu0 %vm69_vm14, %v314_v22  ;;  %254 = vmatmul.msk.f32.gmra.mxu1 %vm73_vm15, %v314_v22 }
  0xa0   :  { %v147_v35 = vpop.f32.mrf.mxu0  ;;  %v159_v36 = vpop.f32.mrf.mxu1 }
  0xa1   :  { %211 = vst [vmem:[%s467_s2] sm:$0xff] %v147_v35 }
  0xa2   :  { %215 = vst [vmem:[%s467_s2 + $0x20] sm:$0xff] %v159_v36 }
  0xa4   :  { %v171_v37 = vpop.f32.mrf.mxu2  ;;  %v183_v38 = vpop.f32.mrf.mxu3 }
  0xa5   :  { %219 = vst [vmem:[%s467_s2 + $0x40] sm:$0xff] %v171_v37 }
  0xa6   :  { %223 = vst [vmem:[%s467_s2 + $0x60] sm:$0xff] %v183_v38 }
  0xa8   :  { %v150_v39 = vpop.f32.mrf.mxu0  ;;  %v162_v40 = vpop.f32.mrf.mxu1 }
  0xa9   :  { %212 = vst [vmem:[%s467_s2 + $0x8] sm:$0xff] %v150_v39 }
  0xaa   :  { %216 = vst [vmem:[%s467_s2 + $0x28] sm:$0xff] %v162_v40 }
  0xac   :  { %v174_v41 = vpop.f32.mrf.mxu2  ;;  %v186_v42 = vpop.f32.mrf.mxu3 }
  0xad   :  { %220 = vst [vmem:[%s467_s2 + $0x48] sm:$0xff] %v174_v41 }
  0xae   :  { %224 = vst [vmem:[%s467_s2 + $0x68] sm:$0xff] %v186_v42 }
  0xb0   :  { %v153_v43 = vpop.f32.mrf.mxu0  ;;  %v165_v44 = vpop.f32.mrf.mxu1 }
  0xb1   :  { %213 = vst [vmem:[%s467_s2 + $0x10] sm:$0xff] %v153_v43 }
  0xb2   :  { %217 = vst [vmem:[%s467_s2 + $0x30] sm:$0xff] %v165_v44 }
  0xb4   :  { %v177_v45 = vpop.f32.mrf.mxu2  ;;  %v189_v46 = vpop.f32.mrf.mxu3 }
  0xb5   :  { %221 = vst [vmem:[%s467_s2 + $0x50] sm:$0xff] %v177_v45 }
  0xb6   :  { %225 = vst [vmem:[%s467_s2 + $0x70] sm:$0xff] %v189_v46 }
  0xb8   :  { %v156_v47 = vpop.f32.mrf.mxu0  ;;  %v168_v48 = vpop.f32.mrf.mxu1 }
  0xb9   :  { %214 = vst [vmem:[%s467_s2 + $0x18] sm:$0xff] %v156_v47 }
  0xba   :  { %218 = vst [vmem:[%s467_s2 + $0x38] sm:$0xff] %v168_v48 }
  0xbc   :  { %v180_v49 = vpop.f32.mrf.mxu2  ;;  %v192_v50 = vpop.f32.mrf.mxu3 }
  0xbd   :  { %222 = vst [vmem:[%s467_s2 + $0x58] sm:$0xff] %v180_v49 }
  0xbe   :  { %226 = vst [vmem:[%s467_s2 + $0x78] sm:$0xff] %v192_v50 }

// kernel: pool.3
= control target key start
LH: loop header
LB: loop body
LE: loop exit
PB: predicated region body
PF: predicated region fallthrough
CT: control target
= control target key end

     0   :  { %v311_v0 = vmov 0   ;;  %v27_v34 = vlaneseq  ;;  %v312_v39 = vmov 1.0   ;;  %s472_s0 = inlined_call_operand.vmem [shape: s32[128,1], index: 0, kind: input, shape index: {}]   ;;  %s473_s1 = inlined_call_operand.vmem [shape: f32[128,128], index: 1, kind: input, shape index: {}]   ;;  %s474_s2 = inlined_call_operand.vmem [shape: f32[128,128], index: 2, kind: output, shape index: {}]  }
   0x1   :  { %310 = vset.pattern.permute.xlu2 %v311_v0  ;;  %309 = vset.pattern.permute.xlu1 %v311_v0  ;;  %v20_v1 = vld [vmem:[%s472_s0 + $0x48] sm:$0xff]  ;;  %v19_v2 = vld [vmem:[%s472_s0 + $0x40] sm:$0xff]  ;;  %v140_v7 = vld [vmem:[%s473_s1 + $0x78] sm:$0xff] }
   0x2   :  { %v11_v3 = vld [vmem:[%s472_s0] sm:$0xff]  ;;  %308 = vset.pattern.permute.xlu0 %v311_v0  ;;  %57 = vperm.xlu2 %310, %v20_v1   ;;  %v24_v4 = vld [vmem:[%s472_s0 + $0x68] sm:$0xff]  ;;  %v139_v8 = vld [vmem:[%s473_s1 + $0x70] sm:$0xff]  ;;  %v28_v35 = vand.u32 127, %v27_v34 }
   0x3   :  { %54 = vperm.xlu0 %308, %v19_v2   ;;  %30 = vperm.xlu1 %309, %v11_v3   ;;  %v23_v5 = vld [vmem:[%s472_s0 + $0x60] sm:$0xff]  ;;  %v138_v9 = vld [vmem:[%s473_s1 + $0x68] sm:$0xff]  ;;  %v21_v10 = vld [vmem:[%s472_s0 + $0x50] sm:$0xff] }
   0x4   :  { %v15_v6 = vld [vmem:[%s472_s0 + $0x20] sm:$0xff]  ;;  %259 = vmatpush.msra.mxu2 %v140_v7  ;;  %141 = vmatpush.msra.mxu0 %v140_v7  ;;  %v12_v11 = vld [vmem:[%s472_s0 + $0x8] sm:$0xff]  ;;  %v17_v13 = vld [vmem:[%s472_s0 + $0x30] sm:$0xff] }
   0x5   :  { %258 = vmatpush.msra.mxu1 %v140_v7  ;;  %260 = vmatpush.msra.mxu3 %v140_v7  ;;  %v16_v12 = vld [vmem:[%s472_s0 + $0x28] sm:$0xff]  ;;  %v25_v14 = vld [vmem:[%s472_s0 + $0x70] sm:$0xff]  ;;  %v14_v16 = vld [vmem:[%s472_s0 + $0x18] sm:$0xff] }
   0x6   :  { %262 = vmatpush.msra.mxu2 %v139_v8  ;;  %142 = vmatpush.msra.mxu0 %v139_v8  ;;  %v13_v15 = vld [vmem:[%s472_s0 + $0x10] sm:$0xff]  ;;  %v22_v17 = vld [vmem:[%s472_s0 + $0x58] sm:$0xff]  ;;  %v137_v20 = vld [vmem:[%s473_s1 + $0x60] sm:$0xff] }
   0x7   :  { %261 = vmatpush.msra.mxu1 %v139_v8  ;;  %263 = vmatpush.msra.mxu3 %v139_v8  ;;  %v26_v18 = vld [vmem:[%s472_s0 + $0x78] sm:$0xff]  ;;  %v135_v22 = vld [vmem:[%s473_s1 + $0x50] sm:$0xff]  ;;  %v134_v23 = vld [vmem:[%s473_s1 + $0x48] sm:$0xff] }
   0x8   :  { %265 = vmatpush.msra.mxu2 %v138_v9  ;;  %143 = vmatpush.msra.mxu0 %v138_v9  ;;  %v18_v19 = vld [vmem:[%s472_s0 + $0x38] sm:$0xff]  ;;  %v133_v24 = vld [vmem:[%s473_s1 + $0x40] sm:$0xff]  ;;  %v131_v26 = vld [vmem:[%s473_s1 + $0x30] sm:$0xff] }
   0x9   :  { %264 = vmatpush.msra.mxu1 %v138_v9  ;;  %266 = vmatpush.msra.mxu3 %v138_v9  ;;  %v136_v21 = vld [vmem:[%s473_s1 + $0x58] sm:$0xff]  ;;  %v130_v27 = vld [vmem:[%s473_s1 + $0x28] sm:$0xff]  ;;  %v129_v28 = vld [vmem:[%s473_s1 + $0x20] sm:$0xff] }
   0xa   :  { %69 = vperm.xlu2 %310, %v24_v4   ;;  %268 = vmatpush.msra.mxu2 %v137_v20  ;;  %v132_v25 = vld [vmem:[%s473_s1 + $0x38] sm:$0xff]  ;;  %v127_v30 = vld [vmem:[%s473_s1 + $0x10] sm:$0xff]  ;;  %v126_v31 = vld [vmem:[%s473_s1 + $0x8] sm:$0xff] }
   0xb   :  { %66 = vperm.xlu0 %308, %v23_v5   ;;  %42 = vperm.xlu1 %309, %v15_v6   ;;  %v128_v29 = vld [vmem:[%s473_s1 + $0x18] sm:$0xff]  ;;  %v125_v32 = vld [vmem:[%s473_s1] sm:$0xff] }
   0xc   :  { %144 = vmatpush.msra.mxu0 %v137_v20  ;;  %267 = vmatpush.msra.mxu1 %v137_v20 }
   0xd   :  { %269 = vmatpush.msra.mxu3 %v137_v20  ;;  %271 = vmatpush.msra.mxu2 %v136_v21 }
   0xe   :  { %145 = vmatpush.msra.mxu0 %v136_v21  ;;  %270 = vmatpush.msra.mxu1 %v136_v21 }
   0xf   :  { %272 = vmatpush.msra.mxu3 %v136_v21  ;;  %274 = vmatpush.msra.mxu2 %v135_v22 }
  0x10   :  { %146 = vmatpush.msra.mxu0 %v135_v22  ;;  %273 = vmatpush.msra.mxu1 %v135_v22 }
  0x11   :  { %275 = vmatpush.msra.mxu3 %v135_v22  ;;  %277 = vmatpush.msra.mxu2 %v134_v23 }
  0x12   :  { %60 = vperm.xlu2 %310, %v21_v10   ;;  %147 = vmatpush.msra.mxu0 %v134_v23 }
  0x13   :  { %33 = vperm.xlu0 %308, %v12_v11   ;;  %45 = vperm.xlu1 %309, %v16_v12  }
  0x14   :  { %276 = vmatpush.msra.mxu1 %v134_v23  ;;  %278 = vmatpush.msra.mxu3 %v134_v23 }
  0x15   :  { %280 = vmatpush.msra.mxu2 %v133_v24  ;;  %148 = vmatpush.msra.mxu0 %v133_v24 }
  0x16   :  { %279 = vmatpush.msra.mxu1 %v133_v24  ;;  %281 = vmatpush.msra.mxu3 %v133_v24 }
  0x17   :  { %283 = vmatpush.msra.mxu2 %v132_v25  ;;  %149 = vmatpush.msra.mxu0 %v132_v25 }
  0x18   :  { %282 = vmatpush.msra.mxu1 %v132_v25  ;;  %284 = vmatpush.msra.mxu3 %v132_v25 }
  0x19   :  { %286 = vmatpush.msra.mxu2 %v131_v26  ;;  %150 = vmatpush.msra.mxu0 %v131_v26 }
  0x1a   :  { %48 = vperm.xlu2 %310, %v17_v13   ;;  %285 = vmatpush.msra.mxu1 %v131_v26 }
  0x1b   :  { %72 = vperm.xlu0 %308, %v25_v14   ;;  %36 = vperm.xlu1 %309, %v13_v15  }
  0x1c   :  { %287 = vmatpush.msra.mxu3 %v131_v26  ;;  %289 = vmatpush.msra.mxu2 %v130_v27 }
  0x1d   :  { %151 = vmatpush.msra.mxu0 %v130_v27  ;;  %288 = vmatpush.msra.mxu1 %v130_v27 }
  0x1e   :  { %290 = vmatpush.msra.mxu3 %v130_v27  ;;  %292 = vmatpush.msra.mxu2 %v129_v28 }
  0x1f   :  { %152 = vmatpush.msra.mxu0 %v129_v28  ;;  %291 = vmatpush.msra.mxu1 %v129_v28 }
  0x20   :  { %293 = vmatpush.msra.mxu3 %v129_v28  ;;  %295 = vmatpush.msra.mxu2 %v128_v29 }
  0x21   :  { %153 = vmatpush.msra.mxu0 %v128_v29  ;;  %294 = vmatpush.msra.mxu1 %v128_v29 }
  0x22   :  { %39 = vperm.xlu2 %310, %v14_v16   ;;  %296 = vmatpush.msra.mxu3 %v128_v29 }
  0x23   :  { %63 = vperm.xlu0 %308, %v22_v17   ;;  %75 = vperm.xlu1 %309, %v26_v18  }
  0x24   :  { %298 = vmatpush.msra.mxu2 %v127_v30  ;;  %154 = vmatpush.msra.mxu0 %v127_v30 }
  0x25   :  { %297 = vmatpush.msra.mxu1 %v127_v30  ;;  %299 = vmatpush.msra.mxu3 %v127_v30 }
  0x26   :  { %301 = vmatpush.msra.mxu2 %v126_v31  ;;  %155 = vmatpush.msra.mxu0 %v126_v31 }
  0x27   :  { %300 = vmatpush.msra.mxu1 %v126_v31  ;;  %302 = vmatpush.msra.mxu3 %v126_v31 }
  0x28   :  { %304 = vmatpush.msra.mxu2 %v125_v32  ;;  %156 = vmatpush.msra.mxu0 %v125_v32 }
  0x29   :  { %303 = vmatpush.msra.mxu1 %v125_v32  ;;  %305 = vmatpush.msra.mxu3 %v125_v32 }
  0x2b   :  { %51 = vperm.xlu0 %308, %v18_v19  }
  0x5c   :  { %v58_v33 = vpop.permute.xlu2 %57 }
  0x5d   :  { %vm86_vm2 = vcmp.eq.s32.totalorder %v58_v33, %v28_v35 }
  0x64   :  { %v70_v36 = vpop.permute.xlu2 %69 }
  0x65   :  { %vm90_vm7 = vcmp.eq.s32.totalorder %v70_v36, %v28_v35 }
  0x6c   :  { %v61_v42 = vpop.permute.xlu2 %60 }
  0x6d   :  { %vm87_vm8 = vcmp.eq.s32.totalorder %v61_v42, %v28_v35 }
  0x74   :  { %v49_v45 = vpop.permute.xlu2 %48 }
  0x75   :  { %v55_v37 = vpop.permute.xlu0 %54  ;;  %v31_v38 = vpop.permute.xlu1 %30  ;;  %vm83_vm9 = vcmp.eq.s32.totalorder %v49_v45, %v28_v35 }
  0x76   :  { %vm85_vm0 = vcmp.eq.s32.totalorder %v55_v37, %v28_v35  ;;  %vm77_vm1 = vcmp.eq.s32.totalorder %v31_v38, %v28_v35 }
  0x77   :  { %250 = vmatmul.msk.f32.vlgmr.msra.gmra.mxu2 %vm85_vm0, %v312_v39  ;;  %242 = vmatmul.msk.f32.vlgmr.msra.gmra.mxu0 %vm77_vm1, %v312_v39 }
  0x7c   :  { %v40_v48 = vpop.permute.xlu2 %39 }
  0x7d   :  { %v67_v40 = vpop.permute.xlu0 %66  ;;  %v43_v41 = vpop.permute.xlu1 %42  ;;  %vm80_vm12 = vcmp.eq.s32.totalorder %v40_v48, %v28_v35 }
  0x7e   :  { %vm89_vm3 = vcmp.eq.s32.totalorder %v67_v40, %v28_v35  ;;  %vm81_vm4 = vcmp.eq.s32.totalorder %v43_v41, %v28_v35 }
  0x7f   :  { %246 = vmatmul.msk.f32.vlgmr.msra.gmra.mxu1 %vm81_vm4, %v312_v39  ;;  %251 = vmatmul.msk.f32.gmra.mxu2 %vm86_vm2, %v312_v39 }
  0x80   :  { %254 = vmatmul.msk.f32.vlgmr.msra.gmra.mxu3 %vm89_vm3, %v312_v39 }
  0x85   :  { %v34_v43 = vpop.permute.xlu0 %33  ;;  %v46_v44 = vpop.permute.xlu1 %45 }
  0x86   :  { %vm78_vm5 = vcmp.eq.s32.totalorder %v34_v43, %v28_v35  ;;  %vm82_vm6 = vcmp.eq.s32.totalorder %v46_v44, %v28_v35 }
  0x87   :  { %243 = vmatmul.msk.f32.gmra.mxu0 %vm78_vm5, %v312_v39  ;;  %247 = vmatmul.msk.f32.gmra.mxu1 %vm82_vm6, %v312_v39 }
  0x88   :  { %252 = vmatmul.msk.f32.gmra.mxu2 %vm87_vm8, %v312_v39  ;;  %255 = vmatmul.msk.f32.gmra.mxu3 %vm90_vm7, %v312_v39 }
  0x8d   :  { %v73_v46 = vpop.permute.xlu0 %72  ;;  %v37_v47 = vpop.permute.xlu1 %36 }
  0x8e   :  { %vm91_vm10 = vcmp.eq.s32.totalorder %v73_v46, %v28_v35  ;;  %vm79_vm11 = vcmp.eq.s32.totalorder %v37_v47, %v28_v35 }
  0x8f   :  { %244 = vmatmul.msk.f32.gmra.mxu0 %vm79_vm11, %v312_v39  ;;  %248 = vmatmul.msk.f32.gmra.mxu1 %vm83_vm9, %v312_v39 }
  0x90   :  { %256 = vmatmul.msk.f32.gmra.mxu3 %vm91_vm10, %v312_v39 }
  0x95   :  { %v64_v49 = vpop.permute.xlu0 %63  ;;  %v76_v50 = vpop.permute.xlu1 %75 }
  0x96   :  { %vm88_vm13 = vcmp.eq.s32.totalorder %v64_v49, %v28_v35  ;;  %vm92_vm14 = vcmp.eq.s32.totalorder %v76_v50, %v28_v35 }
  0x97   :  { %245 = vmatmul.msk.f32.gmra.mxu0 %vm80_vm12, %v312_v39  ;;  %253 = vmatmul.msk.f32.gmra.mxu2 %vm88_vm13, %v312_v39 }
  0x98   :  { %257 = vmatmul.msk.f32.gmra.mxu3 %vm92_vm14, %v312_v39 }
  0x9d   :  { %v52_v51 = vpop.permute.xlu0 %51 }
  0x9e   :  { %vm84_vm15 = vcmp.eq.s32.totalorder %v52_v51, %v28_v35 }
  0x9f   :  { %249 = vmatmul.msk.f32.gmra.mxu1 %vm84_vm15, %v312_v39 }
  0xf4   :  { %v158_v52 = vpop.f32.mrf.mxu0 }
  0xf5   :  { %206 = vst [vmem:[%s474_s2] sm:$0xff] %v158_v52 }
  0xfa   :  { %v182_v53 = vpop.f32.mrf.mxu2 }
  0xfb   :  { %214 = vst [vmem:[%s474_s2 + $0x40] sm:$0xff] %v182_v53 }
  0xfc   :  { %v170_v54 = vpop.f32.mrf.mxu1 }
  0xfd   :  { %210 = vst [vmem:[%s474_s2 + $0x20] sm:$0xff] %v170_v54 }
 0x102   :  { %v185_v55 = vpop.f32.mrf.mxu2 }
 0x103   :  { %215 = vst [vmem:[%s474_s2 + $0x48] sm:$0xff] %v185_v55  ;;  %v194_v56 = vpop.f32.mrf.mxu3 }
 0x104   :  { %218 = vst [vmem:[%s474_s2 + $0x60] sm:$0xff] %v194_v56  ;;  %v161_v57 = vpop.f32.mrf.mxu0  ;;  %v173_v58 = vpop.f32.mrf.mxu1 }
 0x105   :  { %207 = vst [vmem:[%s474_s2 + $0x8] sm:$0xff] %v161_v57 }
 0x106   :  { %211 = vst [vmem:[%s474_s2 + $0x28] sm:$0xff] %v173_v58 }
 0x10b   :  { %v188_v59 = vpop.f32.mrf.mxu2  ;;  %v197_v60 = vpop.f32.mrf.mxu3 }
 0x10c   :  { %216 = vst [vmem:[%s474_s2 + $0x50] sm:$0xff] %v188_v59  ;;  %v164_v61 = vpop.f32.mrf.mxu0  ;;  %v176_v62 = vpop.f32.mrf.mxu1 }
 0x10d   :  { %219 = vst [vmem:[%s474_s2 + $0x68] sm:$0xff] %v197_v60 }
 0x10e   :  { %208 = vst [vmem:[%s474_s2 + $0x10] sm:$0xff] %v164_v61 }
 0x10f   :  { %212 = vst [vmem:[%s474_s2 + $0x30] sm:$0xff] %v176_v62 }
 0x113   :  { %v200_v63 = vpop.f32.mrf.mxu3 }
 0x114   :  { %220 = vst [vmem:[%s474_s2 + $0x70] sm:$0xff] %v200_v63  ;;  %v167_v0 = vpop.f32.mrf.mxu0 }
 0x115   :  { %209 = vst [vmem:[%s474_s2 + $0x18] sm:$0xff] %v167_v0 }
 0x11a   :  { %v191_v1 = vpop.f32.mrf.mxu2 }
 0x11b   :  { %217 = vst [vmem:[%s474_s2 + $0x58] sm:$0xff] %v191_v1  ;;  %v203_v2 = vpop.f32.mrf.mxu3 }
 0x11c   :  { %221 = vst [vmem:[%s474_s2 + $0x78] sm:$0xff] %v203_v2  ;;  %v179_v3 = vpop.f32.mrf.mxu1 }
 0x11d   :  { %213 = vst [vmem:[%s474_s2 + $0x38] sm:$0xff] %v179_v3 }

</bundles_post_ra>
